<compile_context>
chip_gen: v7x
topology: tpu7x:2x2x1
jax: 0.10.0
libtpu: 0.0.40
codegen_flags: <defaults>
</compile_context>

<pallas_src>
import jax
import jax.numpy as jnp
from jax.experimental import pallas as pl
from jax.experimental.pallas import tpu as pltpu


def _proj_kernel(visual_ref, w_ref, k_ref):
    # visual_ref: (1, nv_t, V) bf16   w_ref: (V, T) bf16   k_ref: (1, H, nv_t, d) bf16
    heads = k_ref.shape[1]
    d = k_ref.shape[3]
    # Single MXU matmul, bf16 operands, f32 accumulation (Linear has no bias).
    vc = jnp.dot(visual_ref[0], w_ref[...],
                 preferred_element_type=jnp.float32)          # (nv_t, T) f32
    # Head split folded into the store: k leaves this kernel head-major, so the
    # attention kernel never re-does per-step lane-slice / stack work.
    for h in range(heads):
        k_ref[0, h, :, :] = vc[:, h * d:(h + 1) * d].astype(k_ref.dtype)


def _attn_kernel(q_ref, k_ref, feat_ref, attn_ref):
    # q_ref: (1, H, tq, d) bf16   k_ref: (1, H, N_v, d) bf16
    # feat_ref: (1, tq, T)        attn_ref: (1, H, tq, N_v)
    heads = q_ref.shape[1]
    d = q_ref.shape[3]
    q = q_ref[0]                                               # (H, tq, d)
    k = k_ref[0]                                               # (H, N_v, d)

    # sim[h,i,j] = <q[h,i,:], k[h,j,:]> — head-batched MXU pass, f32 accumulation,
    # no 1/sqrt(d) scale (matches the module).
    sim = jnp.einsum('hid,hjd->hij', q, k,
                     preferred_element_type=jnp.float32)       # (H, tq, N_v) f32

    # Exact f32 softmax over the visual axis (attn is a user-visible probability
    # output, so no approximate reciprocal here).
    m = jnp.max(sim, axis=-1, keepdims=True)
    p = jnp.exp(sim - m)
    attn = p / jnp.sum(p, axis=-1, keepdims=True)              # (H, tq, N_v) f32

    # Direct (B, H, N_t, N_v) store — no concat, no wrapper transpose afterwards.
    # TODO(synk): switch attn's out_shape dtype to bf16 in production to halve the
    # dominant HBM writeback.
    attn_ref[0] = attn.astype(attn_ref.dtype)

    # out[h] = attn[h] @ k[h], all heads in one batched MXU pass; bf16 operands.
    out = jnp.einsum('hij,hjd->hid', attn.astype(k.dtype), k,
                     preferred_element_type=jnp.float32)       # (H, tq, d) f32

    # feat == rearrange 'b h i d -> b i (h d)': per-head static lane-slice stores
    # (no second (tq, T) copy materialized in VMEM).
    for h in range(heads):
        feat_ref[0, :, h * d:(h + 1) * d] = out[h].astype(feat_ref.dtype)


def simplified_cross_attention(visual, textual, w_t, heads, *,
                               q_tile=None, nv_tile=None,
                               compute_dtype=jnp.bfloat16):
    """visual: (B, N_v, V), textual: (B, N_t, T), w_t: (V, T) == proj.weight.T"""
    B, n_v, V = visual.shape
    B2, n_t, T = textual.shape
    assert B == B2 and T % heads == 0 and w_t.shape == (V, T)
    d = T // heads
    q_tile = n_t if q_tile is None else q_tile
    nv_tile = n_v if nv_tile is None else nv_tile
    assert n_t % q_tile == 0 and n_v % nv_tile == 0

    # One-time operand casts: bf16 MXU rate + halved fetch traffic; accumulation
    # everywhere stays f32 via preferred_element_type.
    visual_c = visual.astype(compute_dtype)
    w_c = w_t.astype(compute_dtype)
    # q head split hoisted out of the kernel: one-time layout pass on the small tensor.
    q4 = textual.astype(compute_dtype).reshape(B, n_t, heads, d).transpose(0, 2, 1, 3)

    # ---- projection kernel: k = head_split(visual @ W^T), head-major bf16 ------------
    k4 = pl.pallas_call(
        _proj_kernel,
        out_shape=jax.ShapeDtypeStruct((B, heads, n_v, d), compute_dtype),
        grid=(B, n_v // nv_tile),
        in_specs=[
            pl.BlockSpec((1, nv_tile, V), lambda b, j: (b, j, 0)),
            pl.BlockSpec((V, T), lambda b, j: (0, 0)),   # constant block: not re-fetched
        ],
        out_specs=pl.BlockSpec((1, heads, nv_tile, d), lambda b, j: (b, 0, j, 0)),
        compiler_params=pltpu.CompilerParams(
            dimension_semantics=("parallel", "parallel")),
    )(visual_c, w_c)

    # ---- attention kernel: grid over (batch, q tiles), full attn rows per step -------
    feat, attn = pl.pallas_call(
        _attn_kernel,
        out_shape=(
            jax.ShapeDtypeStruct((B, n_t, T), jnp.float32),
            jax.ShapeDtypeStruct((B, heads, n_t, n_v), jnp.float32),
        ),
        grid=(B, n_t // q_tile),
        in_specs=[
            pl.BlockSpec((1, heads, q_tile, d), lambda b, i: (b, 0, i, 0)),
            pl.BlockSpec((1, heads, n_v, d), lambda b, i: (b, 0, 0, 0)),
        ],
        out_specs=(
            pl.BlockSpec((1, q_tile, T), lambda b, i: (b, i, 0)),
            pl.BlockSpec((1, heads, q_tile, n_v), lambda b, i: (b, 0, i, 0)),
        ),
        compiler_params=pltpu.CompilerParams(
            dimension_semantics=("parallel", "parallel")),
    )(q4, k4)
    return feat, attn


def _reference_f32(visual, textual, w_t, heads):
    """Exact-f32 mirror of the PyTorch forward (HIGHEST matmul precision)."""
    hp = jax.lax.Precision.HIGHEST
    B, n_t, T = textual.shape
    n_v = visual.shape[1]
    d = T // heads
    vc = jnp.einsum('bnv,vt->bnt', visual, w_t, precision=hp)
    q = textual.reshape(B, n_t, heads, d).transpose(0, 2, 1, 3)
    k = vc.reshape(B, n_v, heads, d).transpose(0, 2, 1, 3)
    sim = jnp.einsum('bhid,bhjd->bhij', q, k, precision=hp)
    attn = jax.nn.softmax(sim, axis=-1)
    out = jnp.einsum('bhij,bhjd->bhid', attn, k, precision=hp)
    return out.transpose(0, 2, 1, 3).reshape(B, n_t, T), attn


def _reference_matched(visual, textual, w_t, heads, compute_dtype=jnp.bfloat16):
    """Reference with the same bf16-operand / f32-accumulate numerics as the kernels."""
    B, n_t, T = textual.shape
    n_v = visual.shape[1]
    d = T // heads
    vc = jnp.einsum('bnv,vt->bnt', visual.astype(compute_dtype), w_t.astype(compute_dtype),
                    preferred_element_type=jnp.float32)
    k = vc.astype(compute_dtype).reshape(B, n_v, heads, d).transpose(0, 2, 1, 3)
    q = textual.astype(compute_dtype).reshape(B, n_t, heads, d).transpose(0, 2, 1, 3)
    sim = jnp.einsum('bhid,bhjd->bhij', q, k, preferred_element_type=jnp.float32)
    attn = jax.nn.softmax(sim, axis=-1)
    out = jnp.einsum('bhij,bhjd->bhid', attn.astype(compute_dtype), k,
                     preferred_element_type=jnp.float32)
    return out.transpose(0, 2, 1, 3).reshape(B, n_t, T), attn


if __name__ == "__main__":
    # Small shapes consistent with the forward pass (multi-tile on both grids).
    B, n_v, n_t = 2, 16, 16
    visual_dim, textual_dim, heads = 32, 32, 4

    key = jax.random.PRNGKey(0)
    k1, k2, k3 = jax.random.split(key, 3)
    visual = jax.random.normal(k1, (B, n_v, visual_dim), dtype=jnp.float32)
    textual = jax.random.normal(k2, (B, n_t, textual_dim), dtype=jnp.float32)
    # nn.Linear(visual_dim, textual_dim, bias=False).weight has shape (T, V); the kernel
    # consumes its transpose (V, T) so the projection is a single plain matmul.
    w = jax.random.normal(k3, (textual_dim, visual_dim), dtype=jnp.float32) * 0.1
    w_t = w.T  # (visual_dim, textual_dim)

    feat, attn = simplified_cross_attention(visual, textual, w_t, heads,
                                            q_tile=8, nv_tile=8)
    jax.block_until_ready((feat, attn))

    # 1) Strict check against a reference with identical bf16-operand numerics.
    mf, ma = _reference_matched(visual, textual, w_t, heads)
    assert jnp.allclose(feat, mf, atol=2e-3, rtol=2e-3), "feature mismatch (matched ref)"
    assert jnp.allclose(attn, ma, atol=2e-3, rtol=2e-3), "attn mismatch (matched ref)"

    # 2) Sanity check against the exact-f32 module semantics; tolerance is the
    #    bf16-operand rounding envelope (operands are deliberately cast to bf16 for MXU
    #    rate per the performance review; accumulation/softmax stay f32).
    rf, ra = _reference_f32(visual, textual, w_t, heads)
    assert jnp.allclose(feat, rf, atol=4e-2, rtol=4e-2), "feature mismatch (f32 ref)"
    assert jnp.allclose(attn, ra, atol=4e-2, rtol=4e-2), "attn mismatch (f32 ref)"

    print("KERNEL_OK")
</pallas_src>

<mosaic_0001>
module attributes {stable_mosaic.version = 11 : i64} {
  func.func @_proj_kernel(%arg0: i32, %arg1: i32, %arg2: memref<1x8x32xbf16, #tpu.memory_space<vmem>>, %arg3: memref<32x32xbf16, #tpu.memory_space<vmem>>, %arg4: memref<1x4x8x8xbf16, #tpu.memory_space<vmem>>) attributes {dimension_semantics = [#tpu.dimension_semantics<parallel>, #tpu.dimension_semantics<parallel>], iteration_bounds = array<i64: 2, 2>, scalar_prefetch = 0 : i64, scratch_operands = 0 : i64, tpu.core_type = #tpu.core_type<tc>, window_params = [{transform_indices = @transform_0, window_bounds = array<i64: 1, 8, 32>}, {pipeline_mode = #tpu.pipeline_mode<synchronous>, transform_indices = @transform_1, window_bounds = array<i64: 32, 32>}, {transform_indices = @transform_2, window_bounds = array<i64: 1, 4, 8, 8>}]} {
    %c0 = arith.constant 0 : index
    %c0_0 = arith.constant 0 : index
    %c0_1 = arith.constant 0 : index
    %0 = vector.load %arg2[%c0, %c0_0, %c0_1] : memref<1x8x32xbf16, #tpu.memory_space<vmem>>, vector<1x8x32xbf16>
    %1 = vector.shape_cast %0 : vector<1x8x32xbf16> to vector<8x32xbf16>
    %c0_2 = arith.constant 0 : index
    %c0_3 = arith.constant 0 : index
    %2 = vector.load %arg3[%c0_2, %c0_3] : memref<32x32xbf16, #tpu.memory_space<vmem>>, vector<32x32xbf16>
    %cst = arith.constant dense<0.000000e+00> : vector<8x32xf32>
    %3 = tpu.matmul %1, %2, %cst {dimension_numbers = #tpu.dot_dimension_numbers<[1], [0], [0], [1], [0, 0, 1, 1], [], []>} : vector<8x32xbf16>, vector<32x32xbf16>, vector<8x32xf32> -> vector<8x32xf32>
    %4 = vector.extract_strided_slice %3 {offsets = [0, 0], sizes = [8, 8], strides = [1, 1]} : vector<8x32xf32> to vector<8x8xf32>
    %5 = arith.truncf %4 : vector<8x8xf32> to vector<8x8xbf16>
    %c0_4 = arith.constant 0 : index
    %c0_5 = arith.constant 0 : index
    %c0_6 = arith.constant 0 : index
    %c0_7 = arith.constant 0 : index
    %6 = vector.load %arg4[%c0_4, %c0_5, %c0_6, %c0_7] : memref<1x4x8x8xbf16, #tpu.memory_space<vmem>>, vector<1x1x8x8xbf16>
    %7 = vector.shape_cast %6 : vector<1x1x8x8xbf16> to vector<8x8xbf16>
    %8 = vector.shape_cast %5 : vector<8x8xbf16> to vector<1x1x8x8xbf16>
    tpu.vector_store %arg4[%c0_4, %c0_5, %c0_6, %c0_7], %8 {strides = array<i32>} : memref<1x4x8x8xbf16, #tpu.memory_space<vmem>>, vector<1x1x8x8xbf16>,
    %9 = vector.extract_strided_slice %3 {offsets = [0, 8], sizes = [8, 8], strides = [1, 1]} : vector<8x32xf32> to vector<8x8xf32>
    %10 = arith.truncf %9 : vector<8x8xf32> to vector<8x8xbf16>
    %c0_8 = arith.constant 0 : index
    %c1 = arith.constant 1 : index
    %c0_9 = arith.constant 0 : index
    %c0_10 = arith.constant 0 : index
    %11 = vector.load %arg4[%c0_8, %c1, %c0_9, %c0_10] : memref<1x4x8x8xbf16, #tpu.memory_space<vmem>>, vector<1x1x8x8xbf16>
    %12 = vector.shape_cast %11 : vector<1x1x8x8xbf16> to vector<8x8xbf16>
    %13 = vector.shape_cast %10 : vector<8x8xbf16> to vector<1x1x8x8xbf16>
    tpu.vector_store %arg4[%c0_8, %c1, %c0_9, %c0_10], %13 {strides = array<i32>} : memref<1x4x8x8xbf16, #tpu.memory_space<vmem>>, vector<1x1x8x8xbf16>,
    %14 = vector.extract_strided_slice %3 {offsets = [0, 16], sizes = [8, 8], strides = [1, 1]} : vector<8x32xf32> to vector<8x8xf32>
    %15 = arith.truncf %14 : vector<8x8xf32> to vector<8x8xbf16>
    %c0_11 = arith.constant 0 : index
    %c2 = arith.constant 2 : index
    %c0_12 = arith.constant 0 : index
    %c0_13 = arith.constant 0 : index
    %16 = vector.load %arg4[%c0_11, %c2, %c0_12, %c0_13] : memref<1x4x8x8xbf16, #tpu.memory_space<vmem>>, vector<1x1x8x8xbf16>
    %17 = vector.shape_cast %16 : vector<1x1x8x8xbf16> to vector<8x8xbf16>
    %18 = vector.shape_cast %15 : vector<8x8xbf16> to vector<1x1x8x8xbf16>
    tpu.vector_store %arg4[%c0_11, %c2, %c0_12, %c0_13], %18 {strides = array<i32>} : memref<1x4x8x8xbf16, #tpu.memory_space<vmem>>, vector<1x1x8x8xbf16>,
    %19 = vector.extract_strided_slice %3 {offsets = [0, 24], sizes = [8, 8], strides = [1, 1]} : vector<8x32xf32> to vector<8x8xf32>
    %20 = arith.truncf %19 : vector<8x8xf32> to vector<8x8xbf16>
    %c0_14 = arith.constant 0 : index
    %c3 = arith.constant 3 : index
    %c0_15 = arith.constant 0 : index
    %c0_16 = arith.constant 0 : index
    %21 = vector.load %arg4[%c0_14, %c3, %c0_15, %c0_16] : memref<1x4x8x8xbf16, #tpu.memory_space<vmem>>, vector<1x1x8x8xbf16>
    %22 = vector.shape_cast %21 : vector<1x1x8x8xbf16> to vector<8x8xbf16>
    %23 = vector.shape_cast %20 : vector<8x8xbf16> to vector<1x1x8x8xbf16>
    tpu.vector_store %arg4[%c0_14, %c3, %c0_15, %c0_16], %23 {strides = array<i32>} : memref<1x4x8x8xbf16, #tpu.memory_space<vmem>>, vector<1x1x8x8xbf16>,
    return
  }
  func.func @transform_0(%arg0: i32, %arg1: i32) -> (i32, i32, i32) {
    %c0_i32 = arith.constant 0 : i32
    %c0_i32_0 = arith.constant 0 : i32
    return %arg0, %arg1, %c0_i32 : i32, i32, i32
  }
  func.func @transform_1(%arg0: i32, %arg1: i32) -> (i32, i32) {
    %c0_i32 = arith.constant 0 : i32
    %c0_i32_0 = arith.constant 0 : i32
    %c0_i32_1 = arith.constant 0 : i32
    return %c0_i32, %c0_i32_0 : i32, i32
  }
  func.func @transform_2(%arg0: i32, %arg1: i32) -> (i32, i32, i32, i32) {
    %c0_i32 = arith.constant 0 : i32
    %c0_i32_0 = arith.constant 0 : i32
    %c0_i32_1 = arith.constant 0 : i32
    return %arg0, %c0_i32, %arg1, %c0_i32_0 : i32, i32, i32, i32
  }
}

</mosaic_0001>

<bundles_post_ra>
// kernel: tpu_custom_call.1
= control target key start
LH: loop header
LB: loop body
LE: loop exit
PB: predicated region body
PF: predicated region fallthrough
CT: control target
= control target key end

     0   :  { %s906_s0 = inlined_call_operand.hbm [shape: bf16[2,16,32], index: 0, kind: input, shape index: {}]   ;;  %s907_s1 = inlined_call_operand.hbm [shape: bf16[32,32], index: 1, kind: input, shape index: {}]   ;;  %s908_s2 = inlined_call_operand.vmem [shape: bf16[2,4,16,8], index: 2, kind: output, shape index: {}]  }
   0x1   :  { %913 = sst [smem:[#allocation9_spill]] %s907_s1 }
   0x2   :  { %7 = vsyncpa [#allocation3], 0 }
   0x3   :  { %9 = vsyncpa [#allocation3 + $0x1], 0 }
   0x4   :  { %10 = vsyncpa [#allocation5], 0  ;;  %s701_s9 = smov 0   ;;  %s703_s10 = smov 0  }
   0x5   :  { %s705_s11 = smov 0   ;;  %s707_s12 = smov 0  }
   0x6   :  { %s709_s13 = smov 0   ;;  %s711_s14 = smov 0  }
   0x7   :  { %s713_s15 = smov 0   ;;  %s715_s16 = smov 0  }
   0x8 LB: > { %s420_s17 = sadd.s32 4294967295, %s675_s16   ;;  %p50_p0 = scmp.ne.s32.totalorder %s651_s10, %s647_s9  ;;  %s675_s16 = sphi %s715_s16, %s16_s16   ;;  %s671_s15 = sphi %s713_s15, %s932_s15   ;;  %s667_s14 = sphi %s711_s14, %s931_s14   ;;  %s663_s13 = sphi %s709_s13, %s930_s13   ;;  %s659_s12 = sphi %s707_s12, %s929_s12   ;;  %s655_s11 = sphi %s705_s11, %s928_s11   ;;  %s651_s10 = sphi %s703_s10, %s927_s10   ;;  %s647_s9 = sphi %s701_s9, %s926_s9  }
   0x9   : > { %p743_p1 = scmp.eq.s32.totalorder %s420_s17, 0  ;;  %p422_p2 = scmp.ge.s32.totalorder %s675_s16, 1 }
   0xa   : > { %p110_p3 = scmp.lt.s32.totalorder %s675_s16, 5  ;;  %s677_s21 = smov [#allocation4]  }
   0xb   : > { %s914_s18 = scalar_select %p743_p1, 1, 0 }
   0xc   : > { %p751_p4 = por %p743_p1, %p50_p0  ;;  %p755_p5 = pnand %p422_p2, %p110_p3 }
   0xd   : > { %s122_s22 = sshll.u32 %s677_s21, 4  ;;  %s918_s1 = sld [smem:[#allocation9_spill]]  ;;  %s123_s22 = int_to_ptr.vmem [resolvable:$true] %s122_s22 }
   0xe   : > { %s915_s19 = scalar_select %p751_p4, 1, 0 }
   0xf   : > { %s916_s20 = scalar_select %p755_p5, 1, 0 }
  0x10   : > { %p462_p6 = pneg %p755_p5 }
  0x12   : > { %p763_p7 = pnand %p462_p6, %p743_p1 }
  0x13   : > { %s547_s26 = scalar_lea.hbm %s918_s1, 256 }
  0x14   : > { %p548_p8 = scmp.ne.s32.totalorder %s918_s1, %s547_s26  ;;  %p549_p9 = pneg %p763_p7 }
  0x15   : > { %p554_p12 = scmp.lt.u32.totalorder %s547_s26, %s918_s1 }
  0x16   : > { %p550_p10 = pnand %p549_p9, %p548_p8 }
  0x18   : > { %p551_p11 = pneg %p550_p10 }
  0x1a   : > { %p556_p13 = pnand %p554_p12, %p551_p11 }
  0x1c   : > { %559 = shalt.err (!%p556_p13)
}
  0x1d   : > { %s560_s3 = scalar_lea.vmem %s123_s22, 256  ;;  %p568_p6 = scmp.lt.s32.totalorder %s123_s22, %s123_s22 }
  0x1e   : > { %p561_p0 = scmp.ne.s32.totalorder %s123_s22, %s560_s3  ;;  %p569_p1 = scmp.lt.s32.totalorder %s560_s3, %s560_s3 }
  0x20   : > { %p563_p2 = pnand %p561_p0, %p549_p9  ;;  %p570_p4 = por %p569_p1, %p568_p6 }
  0x22   : > { %p564_p3 = pneg %p563_p2 }
  0x24   : > { %p571_p5 = pnand %p570_p4, %p564_p3 }
  0x26   : > { %574 = shalt.err (!%p571_p5)
}
  0x27   : > { %s678_s4 = smov 64   ;;  %s679_s5 = smov 4  }
  0x28   : > { %465 = dma.hbm_to_vmem [thread:$0]  (!%p763_p7), %s918_s1, 256, %s123_s22, [#allocation5], %s678_s4, %s678_s4, %s679_s5  }
  0x29   : > { %p97_p1 = scmp.eq.s32.totalorder %s420_s17, 3  ;;  %s25_s8 = sadd.s32 1, %s667_s14 }
  0x2a   : > { %p26_p4 = scmp.ge.s32.totalorder %s25_s8, 2  ;;  %s28_s9 = sadd.s32 1, %s671_s15 }
  0x2b   : > { %p44_p5 = scmp.ne.s32.totalorder %s655_s11, %s651_s10  ;;  %p45_p8 = scmp.eq.s32.totalorder %s675_s16, 0 }
  0x2c   : > { %s934_s8 = smov (%p26_p4, %s25_s8), 0  ;;  %s936_s9 = smov (!%p26_p4, %s28_s9), %s671_s15 }
  0x2d   : > { %s33_s21 = ssub.s32 %s667_s14, %s934_s8  ;;  %s37_s23 = sadd.s32 1, %s655_s11 }
  0x2e   : > { %p30_p9 = scmp.ge.s32.totalorder %s936_s9, 2  ;;  %p796_p7 = por %p97_p1, %p44_p5 }
  0x2f   : > { %p800_p10 = por %p45_p8, %p44_p5  ;;  %s136_s24 = sand.u32 1, %s655_s11  }
  0x30   : > { %s938_s9 = smov (%p30_p9, %s936_s9), 0  ;;  %p471_p11 = scmp.lt.s32.totalorder %s675_s16, 4 }
  0x31   : > { %s425_s25 = sshll.u32 %s136_s24, 2  ;;  %s32_s26 = ssub.s32 %s671_s15, %s938_s9 }
  0x32   : > { %s34_s27 = sor.u32 %s33_s21, %s32_s26  ;;  %s426_s28 = sshll.u32 %s671_s15, 1 }
  0x33   : > { %p35_p12 = scmp.eq.s32.totalorder %s34_s27, 0  ;;  %s145_s29 = sadd.s32 %s667_s14, %s426_s28 }
  0x34   : > { %s427_s30 = sshll.u32 %s145_s29, 6  ;;  %s140_s3 = scalar_lea.vmem [#allocation2], %s425_s25 }
  0x35   : > { %s149_s4 = sshll.u32 %s140_s3, 4  ;;  %s818_s1 = scalar_lea.hbm %s906_s0, %s427_s30  ;;  %s820_s4 = int_to_ptr.vmem [resolvable:$true] %s149_s4 }
  0x36   : > { %s813_s5 = scalar_select %p35_p12, %s655_s11, %s37_s23  }
  0x37   : > { %p826_p13 = pnand %p471_p11, %p800_p10  ;;  %s137_s23 = scalar_lea.sflag [#allocation3], %s136_s24 }
  0x38   : > { %s575_s25 = scalar_lea.hbm %s818_s1, 64  ;;  %s580_s17 = scalar_lea.hbm %s906_s0, 256 }
  0x39   : > { %p576_p0 = scmp.ne.s32.totalorder %s818_s1, %s575_s25  ;;  %p577_p2 = pneg %p826_p13 }
  0x3a   : > { %p581_p1 = scmp.lt.u32.totalorder %s818_s1, %s906_s0  ;;  %p582_p4 = scmp.lt.u32.totalorder %s580_s17, %s575_s25 }
  0x3b   : > { %p578_p3 = pnand %p577_p2, %p576_p0  ;;  %p584_p8 = scmp.lt.u32.totalorder %s575_s25, %s818_s1 }
  0x3c   : > { %p583_p5 = por %p582_p4, %p581_p1 }
  0x3d   : > { %p579_p6 = pneg %p578_p3 }
  0x3e   : > { %p585_p9 = por %p584_p8, %p583_p5 }
  0x40   : > { %p586_p10 = pnand %p585_p9, %p579_p6 }
  0x42   : > { %589 = shalt.err (!%p586_p10)
}
  0x43   : > { %s590_s24 = scalar_lea.vmem %s820_s4, 64  ;;  %s680_s30 = smov [#allocation2]  }
  0x44   : > { %p591_p11 = scmp.ne.s32.totalorder %s820_s4, %s590_s24  ;;  %s595_s3 = sshll.u32 %s680_s30, 4  ;;  %s596_s3 = int_to_ptr.vmem [resolvable:$false] %s595_s3 }
  0x45   : > { %s597_s6 = scalar_lea.vmem %s596_s3, 128  ;;  %p598_p3 = scmp.lt.s32.totalorder %s820_s4, %s596_s3 }
  0x46   : > { %p593_p12 = pnand %p591_p11, %p577_p2  ;;  %p599_p1 = scmp.lt.s32.totalorder %s597_s6, %s590_s24 }
  0x48   : > { %p594_p0 = pneg %p593_p12  ;;  %p600_p4 = por %p599_p1, %p598_p3 }
  0x4a   : > { %p601_p5 = pnand %p600_p4, %p594_p0 }
  0x4c   : > { %604 = shalt.err (!%p601_p5)
}
  0x4d   : > { %469 = dma.hbm_to_vmem [thread:$0]  (!%p826_p13), %s818_s1, 64, %s820_s4, %s137_s23  }
  0x4e   : > { %p922_p6 = scmp.ne.s32.totalorder %s916_s20, 0 }
  0x4f   : > { %s858_s7 = sand.u32 (!%p922_p6), 1, %s651_s10   ;;  %p923_p2 = scmp.ne.s32.totalorder (!%p922_p6), %s915_s19, 0 }
  0x50   : > { %158 = sbr.rel (%p922_p6) target bundleno = 442 (0x1ba), region = 28  ;;  %s429_s25 = sshll.u32 (!%p922_p6), %s858_s7, 2 }
  0x51   : > { %s161_s26 = scalar_lea.sflag (!%p922_p6), [#allocation3], %s858_s7  ;;  %s164_s27 = scalar_lea.vmem (!%p922_p6), [#allocation2], %s429_s25 }
  0x57   : > { %638 = dma.done.wait (%p923_p2), %s161_s26, 64  }
  0x58   : > { %640 = vsyncadd (%p923_p2), %s161_s26, 4294967232  ;;  %p924_p8 = scmp.ne.s32.totalorder %s914_s18, 0 }
  0x5a   : > { %642 = dma.done.wait (%p924_p8), [#allocation5], 256  }
  0x5b   : > { %644 = vsyncadd (%p924_p8), [#allocation5], 4294967040  ;;  %v681_v0 = vmov 0.0   ;;  %vm682_vm0 = vmmov 0   ;;  %v545_v1 = vld [vmem:[#allocation4] sm:$0xff]   ;;  %v546_v2 = vld [vmem:[#allocation4 + $0x8] sm:$0xff]  }
  0x5c   : > { %448 = vmatprep.subr.bf16.mxu0 %v681_v0  ;;  %452 = vmatprep.mubr.msk.bf16.mxu0 %vm682_vm0, %v681_v0  ;;  %v189_v3 = vld [vmem:[%s164_s27] sm:$0xf]  ;;  %vm206_vm1 = vcmask 261120   ;;  %s431_s1 = sshll.u32 %s858_s7, 4  ;;  %vm251_vm2 = vcmask 60416   ;;  %s683_s18 = smov 104  }
  0x5d   : > { %449 = vmatpush3.bf16.msra.mxu0 %v545_v1  ;;  %s684_s19 = smov 120   ;;  %s187_s20 = scalar_lea.vmem [#allocation6], %s431_s1 }
  0x5e   : > { %450 = vmatprep.subr.bf16.mxu0 %v681_v0  ;;  %s685_s4 = smov 112   ;;  %s440_s21 = sshll.u32 (%p796_p7), %s663_s13, 3 }
  0x5f   : > { %s279_s23 = sadd.s32 (%p796_p7), %s659_s12, %s440_s21 }
  0x60   : > { %s441_s17 = sshll.u32 (%p796_p7), %s279_s23, 2 }
  0x61   : > { %451 = vmatpush3.bf16.msra.mxu0 %v546_v2  ;;  %s281_s24 = scalar_lea.vmem (%p796_p7), %s908_s2, %s441_s17 }
  0x64   : > { %453 = vmatmul.mubr.msk.bf16.vlgmr.msra.gmra.mrb[0].mxu0 %vm206_vm1, %v189_v3 }
 0x137   : > { %v244_v4 = vpop.f32.mrb[0].mxu0 }
 0x138   : > { %v250_v5 = vpack.c.bf16 %v244_v4, %v244_v4  ;;  %v454_v6 = vpop.f32.mrb[1].mxu0 }
 0x139   : > { %v247_v7 = vpop.f32.mrb[2].mxu0 }
 0x13a   : > { %266 = vrot.lane.b32.xlu1 %v250_v5, %s683_s18  ;;  %256 = vrot.lane.b32.xlu0 %v250_v5, %s684_s19  ;;  %v455_v8 = vpop.f32.mrb[3].mxu0  ;;  %252 = vst.msk [vmem:[%s187_s20] sm:$0xf] %vm251_vm2, %v250_v5 }
 0x13e   : > { %261 = vrot.lane.b32.xlu0 %v250_v5, %s685_s4 }
 0x141   : > { %v297_v12 = vld [vmem:[%s187_s20] sm:$0xf] (%p796_p7) }
 0x142   : > { %298 = vst [vmem:[%s281_s24] sm:$0xf] (%p796_p7), %v297_v12 }
 0x1ab   : > { %277 = sbr.rel (!%p796_p7) target bundleno = 442 (0x1ba), region = 40 }
 0x1ac   : > { %v267_v9 = vpop.permute.xlu1 %266  ;;  %v257_v10 = vpop.permute.xlu0 %256 }
 0x1ad   : > { %438 = vst.msk [vmem:[%s187_s20 + $0xc] sm:$0xf] %vm251_vm2, %v267_v9  ;;  %436 = vst.msk [vmem:[%s187_s20 + $0x4] sm:$0xf] %vm251_vm2, %v257_v10 }
 0x1b0   : > { %v262_v11 = vpop.permute.xlu0 %261 }
 0x1b1   : > { %437 = vst.msk [vmem:[%s187_s20 + $0x8] sm:$0xf] %vm251_vm2, %v262_v11 }
 0x1b4   : > { %v299_v13 = vld [vmem:[%s187_s20 + $0x4] sm:$0xf]  ;;  %v303_v15 = vld [vmem:[%s187_s20 + $0xc] sm:$0xf] }
 0x1b5   : > { %300 = vst [vmem:[%s281_s24 + $0x8] sm:$0xf] %v299_v13  ;;  %304 = vst [vmem:[%s281_s24 + $0x18] sm:$0xf] %v303_v15 }
 0x1b8   : > { %v301_v14 = vld [vmem:[%s187_s20 + $0x8] sm:$0xf] }
 0x1b9   : > { %302 = vst [vmem:[%s281_s24 + $0x10] sm:$0xf] %v301_v14 }
 0x1ba PF: > { %s16_s16 = sadd.s32 1, %s675_s16   ;;  %s925_s22 = smov %s938_s9 }
 0x1bb   : > { %p13_p7 = scmp.ge.s32.totalorder %s16_s16, 6   ;;  %s926_s9 = smov %s651_s10 }
 0x1bc   : > { %s927_s10 = smov %s655_s11  ;;  %s928_s11 = smov %s813_s5 }
 0x1bd   : > { %s929_s12 = smov %s667_s14  ;;  %s930_s13 = smov %s671_s15 }
 0x1be   : > { %s931_s14 = smov %s934_s8  ;;  %s932_s15 = smov %s925_s22 }
 0x1bf   :  { %15 = sbr.rel (!%p13_p7) target bundleno = 8 (0x8), region = 116 }
 0x1c6   :  { %345 = vsyncpa [#allocation3], 1 }
 0x1c7   :  { %347 = vsyncpa [#allocation3 + $0x1], 1 }
 0x1c8   :  { %348 = vsyncpa [#allocation5], 1 }

</bundles_post_ra>
